<compile_context>
chip_gen: v5e
topology: v5e:2x2
jax: 0.10.0
libtpu: 0.0.40
codegen_flags: <defaults>
</compile_context>

<pallas_src>
import functools
import numpy as np
import jax
import jax.numpy as jnp
from jax.experimental import pallas as pl
from jax.experimental.pallas import tpu as pltpu


T_TILE = 128          # CQT time-tile -> lane axis of the output blocks
GROUP = 128           # downsampler output group -> lane axis / matmul N


# --------------------------------------------------------------------------
# deterministic parameter construction (numpy, mirrors the module __init__)
# --------------------------------------------------------------------------
def nextpow2(A):
    return int(np.ceil(np.log2(A)))


def hann_periodic(l):
    n = np.arange(l)
    return 0.5 - 0.5 * np.cos(2.0 * np.pi * n / l)


def create_lowpass_filter(band_center=0.5, kernel_length=256, transition_bw=0.03):
    # TODO(synk): scipy.signal.firwin2 replaced by a deterministic windowed-sinc
    # lowpass of identical length/cutoff (transition_bw is ignored).
    n = np.arange(kernel_length) - (kernel_length - 1) / 2.0
    h = band_center * np.sinc(band_center * n)
    h = h * np.hamming(kernel_length)
    h = h / np.sum(h)
    return h.astype(np.float32)


def create_cqt_kernels(Q, fs, fmin, n_bins, bins_per_octave, norm=1):
    fftLen = 2 ** nextpow2(np.ceil(Q * fs / fmin))
    freqs = fmin * 2.0 ** (np.arange(n_bins) / float(bins_per_octave))
    tempKernel = np.zeros((int(n_bins), int(fftLen)), dtype=np.complex64)
    for k in range(int(n_bins)):
        freq = freqs[k]
        l = int(np.ceil(Q * fs / freq))
        if l % 2 == 1:
            start = int(np.ceil(fftLen / 2.0 - l / 2.0)) - 1
        else:
            start = int(np.ceil(fftLen / 2.0 - l / 2.0))
        phase = np.arange((-l) // 2, l // 2)
        sig = hann_periodic(l) * np.exp(phase * 1j * 2 * np.pi * freq / fs) / l
        if norm:
            sig = sig / np.linalg.norm(sig, norm)
        tempKernel[k, start:start + l] = sig
    return tempKernel, int(fftLen)


class CQT2019Params:
    def __init__(self, sr=8000, hop_length=128, fmin=200, fmax=None, n_bins=24,
                 bins_per_octave=12, norm=True, basis_norm=1, pad_mode='reflect',
                 earlydownsample=True):
        self.norm = norm                     # stored; unused in forward (as in spec)
        self.hop_length = hop_length
        self.pad_mode = pad_mode
        self.n_bins = n_bins
        self.earlydownsample = earlydownsample
        Q = 1.0 / (2 ** (1.0 / bins_per_octave) - 1)
        self.lowpass_filter = create_lowpass_filter(0.5, 256, 0.001)
        n_filters = min(bins_per_octave, n_bins)
        self.n_octaves = int(np.ceil(float(n_bins) / bins_per_octave))
        self.fmin_t = fmin * 2 ** (self.n_octaves - 1)
        remainder = n_bins % bins_per_octave
        if remainder == 0:
            fmax_t = self.fmin_t * 2 ** ((bins_per_octave - 1) / bins_per_octave)
        else:
            fmax_t = self.fmin_t * 2 ** ((remainder - 1) / bins_per_octave)
        self.fmin_t = fmax_t / 2 ** (1 - 1.0 / bins_per_octave)
        if fmax_t > sr / 2:
            raise ValueError("top bin exceeds Nyquist, reduce n_bins")
        if self.earlydownsample:
            (sr, self.hop_length, self.downsample_factor,
             self.early_downsample_filter, self.earlydownsample) = \
                self._get_early_downsample_params(sr, self.hop_length, fmax_t, Q,
                                                  self.n_octaves)
        else:
            self.downsample_factor = 1
            self.early_downsample_filter = None
        basis, self.n_fft = create_cqt_kernels(Q, sr, self.fmin_t, n_filters,
                                               bins_per_octave, norm=basis_norm)
        self.cqt_kernels_real = basis.real.astype(np.float32)  # (n_filters, n_fft)
        self.cqt_kernels_imag = basis.imag.astype(np.float32)
        self.n_filters = n_filters
        # Fused real|imag weight, rows padded so the imag block starts on a
        # sublane-group boundary.  Shape (2*nf_pad, n_fft) -> single MXU matmul.
        self.nf_pad = ((n_filters + 7) // 8) * 8
        w = np.zeros((2 * self.nf_pad, self.n_fft), dtype=np.float32)
        w[:n_filters] = self.cqt_kernels_real
        w[self.nf_pad:self.nf_pad + n_filters] = self.cqt_kernels_imag
        self.cqt_weight_fused = w

    def _early_downsample_count(self, nyquist, filter_cutoff, hop_length, n_octaves):
        c1 = max(0, int(np.ceil(np.log2(0.85 * nyquist / filter_cutoff)) - 1) - 1)
        num_twos = nextpow2(hop_length)
        c2 = max(0, num_twos - n_octaves + 1)
        return min(c1, c2)

    def _get_early_downsample_params(self, sr, hop_length, fmax_t, Q, n_octaves):
        window_bandwidth = 1.5
        filter_cutoff = fmax_t * (1 + 0.5 * window_bandwidth / Q)
        count = self._early_downsample_count(sr // 2, filter_cutoff, hop_length,
                                             n_octaves)
        downsample_factor = 2 ** count
        hop_length = hop_length // downsample_factor
        new_sr = sr / float(downsample_factor)
        if downsample_factor != 1:
            early_filter = create_lowpass_filter(1.0 / downsample_factor, 256, 0.03)
            early = True
        else:
            early_filter = None
            early = False
        return new_sr, hop_length, downsample_factor, early_filter, early


# --------------------------------------------------------------------------
# Pallas kernels
# --------------------------------------------------------------------------
def _cqt_mag_kernel(w_ref, f_ref, o_ref, *, nf_pad):
    """One fused real|imag CQT matmul (K = n_fft) + magnitude for a 128-frame tile.

    w_ref: (2*nf_pad, n_fft) bf16   fused [real ; imag] basis (transposed)
    f_ref: (1, n_fft, T_TILE) bf16  lane-dense frame slab (frames on the lane axis)
    o_ref: (1, nf_pad, T_TILE) f32  CQT magnitude, already in (bins, time) layout
    """
    w = w_ref[...]
    fr = f_ref[0]
    acc = jnp.dot(w, fr, preferred_element_type=jnp.float32)   # (2*nf_pad, T_TILE)
    re = acc[:nf_pad, :]          # sublane-aligned static slices (nf_pad % 8 == 0)
    im = acc[nf_pad:, :]
    o_ref[0] = jnp.sqrt(re * re + im * im)


def _cqt_octave(x, w_fused, hop, n_fft, n_filters, nf_pad):
    """Strided conv1d with the complex CQT basis + magnitude.

    x: (B, L) f32.  Returns (B, n_filters, T) f32 in PyTorch layout."""
    B, L = x.shape
    assert n_fft % hop == 0, "this implementation requires hop | n_fft"
    R = n_fft // hop
    pad = n_fft // 2
    x_pad = jnp.pad(x, ((0, 0), (pad, pad)), mode='reflect')      # ReflectionPad1d
    Lp = L + 2 * pad
    T = (Lp - n_fft) // hop + 1
    n_t = -(-T // T_TILE)
    T_pad = n_t * T_TILE
    Lz = (T_pad + R - 1) * hop            # samples needed by the (., hop) frame view
    if Lz >= Lp:
        x_pad = jnp.pad(x_pad, ((0, 0), (0, Lz - Lp)))
    else:
        x_pad = x_pad[:, :Lz]
    xr = x_pad.reshape(B, T_pad + R - 1, hop)          # metadata reshape (row-major)
    # frames_T[b, j*hop + k, t] = x_pad[b, t*hop + j*hop + k]   -> lane-dense RHS.
    frames = jnp.concatenate([xr[:, j:j + T_pad, :] for j in range(R)], axis=2)
    frames_T = jnp.transpose(frames, (0, 2, 1)).astype(jnp.bfloat16)  # (B, n_fft, T_pad)

    out = pl.pallas_call(
        functools.partial(_cqt_mag_kernel, nf_pad=nf_pad),
        out_shape=jax.ShapeDtypeStruct((B, nf_pad, T_pad), jnp.float32),
        grid_spec=pltpu.PrefetchScalarGridSpec(
            num_scalar_prefetch=0,
            grid=(B, n_t),
            in_specs=[
                # weight block index is constant across the grid -> stays resident
                pl.BlockSpec((2 * nf_pad, n_fft), lambda b, t: (0, 0)),
                pl.BlockSpec((1, n_fft, T_TILE), lambda b, t: (b, 0, t)),
            ],
            out_specs=pl.BlockSpec((1, nf_pad, T_TILE), lambda b, t: (b, 0, t)),
        ),
        compiler_params=pltpu.CompilerParams(
            dimension_semantics=("parallel", "parallel"),
            vmem_limit_bytes=32 * 1024 * 1024,
        ),
    )(w_fused, frames_T)
    return out[:, :n_filters, :T]


def _downsample_kernel(x_ref, w_ref, o_ref, *, n_g, hop_f, R):
    """Grouped lowpass conv as R frame matmuls, accumulated locally (single store)."""
    xs = x_ref[0]                  # (M, hop_f) bf16  (cast in wrapper: half the DMA)
    w = w_ref[...]                 # (Kf, G)    bf16
    acc = jnp.dot(xs[0:n_g, :], w[0:hop_f, :],
                  preferred_element_type=jnp.float32)
    for j in range(1, R):          # static unroll (R is typically 2)
        acc = acc + jnp.dot(xs[j:j + n_g, :],
                            w[j * hop_f:(j + 1) * hop_f, :],
                            preferred_element_type=jnp.float32)
    o_ref[0] = acc


def _downsample(x, filt, stride, group=GROUP):
    """conv1d(x, filt, stride=stride, padding=(K-1)//2) for a single-channel lowpass
    filter, computed as a grouped frame matmul (G=128 output lanes). x: (B, L) f32."""
    B, L = x.shape
    K = int(filt.shape[0])
    pad = (K - 1) // 2
    Lp = L + 2 * pad
    L_out = (Lp - K) // stride + 1
    G = group
    n_g = -(-L_out // G)
    hop_f = stride * G
    Kf_raw = K + stride * (G - 1)
    Kf = -(-Kf_raw // hop_f) * hop_f
    R = Kf // hop_f
    # grouped weight: Wg[stride*g + k, g] = filt[k]
    fnp = np.asarray(filt, dtype=np.float32)
    Wg = np.zeros((Kf, G), dtype=np.float32)
    for g in range(G):
        Wg[stride * g: stride * g + K, g] = fnp
    Wg = jnp.asarray(Wg, dtype=jnp.bfloat16)
    Lx = (n_g - 1) * hop_f + Kf
    extra = Lx - Lp
    if extra >= 0:
        x_pad = jnp.pad(x, ((0, 0), (pad, pad + extra)))     # zero padding (conv1d)
    else:
        x_pad = jnp.pad(x, ((0, 0), (pad, pad)))[:, :Lx]
    M = Lx // hop_f
    xr = x_pad.reshape(B, M, hop_f).astype(jnp.bfloat16)   # bf16 before the DMA

    out = pl.pallas_call(
        functools.partial(_downsample_kernel, n_g=n_g, hop_f=hop_f, R=R),
        out_shape=jax.ShapeDtypeStruct((B, n_g, G), jnp.float32),
        grid_spec=pltpu.PrefetchScalarGridSpec(
            num_scalar_prefetch=0,
            grid=(B,),
            in_specs=[
                pl.BlockSpec((1, M, hop_f), lambda b: (b, 0, 0)),
                pl.BlockSpec((Kf, G), lambda b: (0, 0)),
            ],
            out_specs=pl.BlockSpec((1, n_g, G), lambda b: (b, 0, 0)),
        ),
        compiler_params=pltpu.CompilerParams(
            dimension_semantics=("parallel",),
            vmem_limit_bytes=32 * 1024 * 1024,
        ),
    )(xr, Wg)
    return out.reshape(B, n_g * G)[:, :L_out]


# --------------------------------------------------------------------------
# forward (mirrors CQT2019.forward)
# --------------------------------------------------------------------------
def cqt2019_forward(params, x):
    # broadcast_dim: accept (L,), (B, L) or (B, 1, L)
    if x.ndim == 1:
        x = x[None, :]
    elif x.ndim == 3:
        x = x[:, 0, :]
    x = x.astype(jnp.float32)

    if params.earlydownsample:
        x = _downsample(x, params.early_downsample_filter,
                        int(params.downsample_factor))

    w_fused = jnp.asarray(params.cqt_weight_fused, dtype=jnp.bfloat16)

    hop = params.hop_length
    CQT = _cqt_octave(x, w_fused, hop, params.n_fft, params.n_filters, params.nf_pad)
    x_down = x
    cqts = [CQT]
    for _ in range(params.n_octaves - 1):
        hop = hop // 2
        x_down = _downsample(x_down, params.lowpass_filter, 2)
        CQT1 = _cqt_octave(x_down, w_fused, hop, params.n_fft,
                           params.n_filters, params.nf_pad)
        cqts.insert(0, CQT1)                  # torch.cat((CQT1, CQT), dim=1)
    CQT = jnp.concatenate(cqts, axis=1)
    CQT = CQT[:, -params.n_bins:, :]
    CQT = CQT * (2 ** (params.n_octaves - 1))
    CQT = CQT * params.downsample_factor / (2 ** (params.n_octaves - 1))
    return CQT


if __name__ == "__main__":
    # small, consistent configuration: 2 octaves, 24 bins, early downsample by 2
    params = CQT2019Params(sr=8000, hop_length=128, fmin=200, n_bins=24,
                           bins_per_octave=12, earlydownsample=True)

    key = jax.random.PRNGKey(0)
    B, L = 2, 2048
    x = jax.random.normal(key, (B, L), dtype=jnp.float32)

    out = jax.jit(lambda inp: cqt2019_forward(params, inp))(x)
    out = jax.block_until_ready(out)

    assert out.ndim == 3 and out.shape[0] == B and out.shape[1] == params.n_bins, out.shape
    assert bool(jnp.all(jnp.isfinite(out)))
    print("KERNEL_OK")
</pallas_src>

<mosaic_0001>
module attributes {stable_mosaic.version = 11 : i64} {
  func.func @_downsample_kernel(%arg0: i32, %arg1: memref<1x9x256xbf16, #tpu.memory_space<vmem>>, %arg2: memref<512x128xbf16, #tpu.memory_space<vmem>>, %arg3: memref<1x8x128xf32, #tpu.memory_space<vmem>>) attributes {dimension_semantics = [#tpu.dimension_semantics<parallel>], iteration_bounds = array<i64: 2>, scalar_prefetch = 0 : i64, scratch_operands = 0 : i64, tpu.core_type = #tpu.core_type<tc>, window_params = [{transform_indices = @transform_0, window_bounds = array<i64: 1, 9, 256>}, {pipeline_mode = #tpu.pipeline_mode<synchronous>, transform_indices = @transform_1, window_bounds = array<i64: 512, 128>}, {transform_indices = @transform_2, window_bounds = array<i64: 1, 8, 128>}]} {
    %c0 = arith.constant 0 : index
    %c0_0 = arith.constant 0 : index
    %c0_1 = arith.constant 0 : index
    %0 = vector.load %arg1[%c0, %c0_0, %c0_1] : memref<1x9x256xbf16, #tpu.memory_space<vmem>>, vector<1x9x256xbf16>
    %1 = vector.shape_cast %0 : vector<1x9x256xbf16> to vector<9x256xbf16>
    %c0_2 = arith.constant 0 : index
    %c0_3 = arith.constant 0 : index
    %2 = vector.load %arg2[%c0_2, %c0_3] : memref<512x128xbf16, #tpu.memory_space<vmem>>, vector<512x128xbf16>
    %3 = vector.extract_strided_slice %1 {offsets = [0, 0], sizes = [8, 256], strides = [1, 1]} : vector<9x256xbf16> to vector<8x256xbf16>
    %4 = vector.extract_strided_slice %2 {offsets = [0, 0], sizes = [256, 128], strides = [1, 1]} : vector<512x128xbf16> to vector<256x128xbf16>
    %cst = arith.constant dense<0.000000e+00> : vector<8x128xf32>
    %5 = tpu.matmul %3, %4, %cst {dimension_numbers = #tpu.dot_dimension_numbers<[1], [0], [0], [1], [0, 0, 1, 1], [], []>} : vector<8x256xbf16>, vector<256x128xbf16>, vector<8x128xf32> -> vector<8x128xf32>
    %6 = vector.extract_strided_slice %1 {offsets = [1, 0], sizes = [8, 256], strides = [1, 1]} : vector<9x256xbf16> to vector<8x256xbf16>
    %7 = vector.extract_strided_slice %2 {offsets = [256, 0], sizes = [256, 128], strides = [1, 1]} : vector<512x128xbf16> to vector<256x128xbf16>
    %cst_4 = arith.constant dense<0.000000e+00> : vector<8x128xf32>
    %8 = tpu.matmul %6, %7, %cst_4 {dimension_numbers = #tpu.dot_dimension_numbers<[1], [0], [0], [1], [0, 0, 1, 1], [], []>} : vector<8x256xbf16>, vector<256x128xbf16>, vector<8x128xf32> -> vector<8x128xf32>
    %9 = arith.addf %5, %8 : vector<8x128xf32>
    %c0_5 = arith.constant 0 : index
    %c0_6 = arith.constant 0 : index
    %c0_7 = arith.constant 0 : index
    %10 = vector.load %arg3[%c0_5, %c0_6, %c0_7] : memref<1x8x128xf32, #tpu.memory_space<vmem>>, vector<1x8x128xf32>
    %11 = vector.shape_cast %10 : vector<1x8x128xf32> to vector<8x128xf32>
    %12 = vector.shape_cast %9 : vector<8x128xf32> to vector<1x8x128xf32>
    tpu.vector_store %arg3[%c0_5, %c0_6, %c0_7], %12 {strides = array<i32>} : memref<1x8x128xf32, #tpu.memory_space<vmem>>, vector<1x8x128xf32>,
    return
  }
  func.func @transform_0(%arg0: i32) -> (i32, i32, i32) {
    %c0_i32 = arith.constant 0 : i32
    %c0_i32_0 = arith.constant 0 : i32
    %c0_i32_1 = arith.constant 0 : i32
    return %arg0, %c0_i32, %c0_i32_0 : i32, i32, i32
  }
  func.func @transform_1(%arg0: i32) -> (i32, i32) {
    %c0_i32 = arith.constant 0 : i32
    %c0_i32_0 = arith.constant 0 : i32
    %c0_i32_1 = arith.constant 0 : i32
    return %c0_i32, %c0_i32_0 : i32, i32
  }
  func.func @transform_2(%arg0: i32) -> (i32, i32, i32) {
    %c0_i32 = arith.constant 0 : i32
    %c0_i32_0 = arith.constant 0 : i32
    %c0_i32_1 = arith.constant 0 : i32
    return %arg0, %c0_i32, %c0_i32_0 : i32, i32, i32
  }
}

module attributes {stable_mosaic.version = 11 : i64} {
  func.func @_downsample_kernel(%arg0: i32, %arg1: memref<1x5x256xbf16, #tpu.memory_space<vmem>>, %arg2: memref<512x128xbf16, #tpu.memory_space<vmem>>, %arg3: memref<1x4x128xf32, #tpu.memory_space<vmem>>) attributes {dimension_semantics = [#tpu.dimension_semantics<parallel>], iteration_bounds = array<i64: 2>, scalar_prefetch = 0 : i64, scratch_operands = 0 : i64, tpu.core_type = #tpu.core_type<tc>, window_params = [{transform_indices = @transform_0, window_bounds = array<i64: 1, 5, 256>}, {pipeline_mode = #tpu.pipeline_mode<synchronous>, transform_indices = @transform_1, window_bounds = array<i64: 512, 128>}, {transform_indices = @transform_2, window_bounds = array<i64: 1, 4, 128>}]} {
    %c0 = arith.constant 0 : index
    %c0_0 = arith.constant 0 : index
    %c0_1 = arith.constant 0 : index
    %0 = vector.load %arg1[%c0, %c0_0, %c0_1] : memref<1x5x256xbf16, #tpu.memory_space<vmem>>, vector<1x5x256xbf16>
    %1 = vector.shape_cast %0 : vector<1x5x256xbf16> to vector<5x256xbf16>
    %c0_2 = arith.constant 0 : index
    %c0_3 = arith.constant 0 : index
    %2 = vector.load %arg2[%c0_2, %c0_3] : memref<512x128xbf16, #tpu.memory_space<vmem>>, vector<512x128xbf16>
    %3 = vector.extract_strided_slice %1 {offsets = [0, 0], sizes = [4, 256], strides = [1, 1]} : vector<5x256xbf16> to vector<4x256xbf16>
    %4 = vector.extract_strided_slice %2 {offsets = [0, 0], sizes = [256, 128], strides = [1, 1]} : vector<512x128xbf16> to vector<256x128xbf16>
    %cst = arith.constant dense<0.000000e+00> : vector<4x128xf32>
    %5 = tpu.matmul %3, %4, %cst {dimension_numbers = #tpu.dot_dimension_numbers<[1], [0], [0], [1], [0, 0, 1, 1], [], []>} : vector<4x256xbf16>, vector<256x128xbf16>, vector<4x128xf32> -> vector<4x128xf32>
    %6 = vector.extract_strided_slice %1 {offsets = [1, 0], sizes = [4, 256], strides = [1, 1]} : vector<5x256xbf16> to vector<4x256xbf16>
    %7 = vector.extract_strided_slice %2 {offsets = [256, 0], sizes = [256, 128], strides = [1, 1]} : vector<512x128xbf16> to vector<256x128xbf16>
    %cst_4 = arith.constant dense<0.000000e+00> : vector<4x128xf32>
    %8 = tpu.matmul %6, %7, %cst_4 {dimension_numbers = #tpu.dot_dimension_numbers<[1], [0], [0], [1], [0, 0, 1, 1], [], []>} : vector<4x256xbf16>, vector<256x128xbf16>, vector<4x128xf32> -> vector<4x128xf32>
    %9 = arith.addf %5, %8 : vector<4x128xf32>
    %c0_5 = arith.constant 0 : index
    %c0_6 = arith.constant 0 : index
    %c0_7 = arith.constant 0 : index
    %10 = vector.load %arg3[%c0_5, %c0_6, %c0_7] : memref<1x4x128xf32, #tpu.memory_space<vmem>>, vector<1x4x128xf32>
    %11 = vector.shape_cast %10 : vector<1x4x128xf32> to vector<4x128xf32>
    %12 = vector.shape_cast %9 : vector<4x128xf32> to vector<1x4x128xf32>
    tpu.vector_store %arg3[%c0_5, %c0_6, %c0_7], %12 {strides = array<i32>} : memref<1x4x128xf32, #tpu.memory_space<vmem>>, vector<1x4x128xf32>,
    return
  }
  func.func @transform_0(%arg0: i32) -> (i32, i32, i32) {
    %c0_i32 = arith.constant 0 : i32
    %c0_i32_0 = arith.constant 0 : i32
    %c0_i32_1 = arith.constant 0 : i32
    return %arg0, %c0_i32, %c0_i32_0 : i32, i32, i32
  }
  func.func @transform_1(%arg0: i32) -> (i32, i32) {
    %c0_i32 = arith.constant 0 : i32
    %c0_i32_0 = arith.constant 0 : i32
    %c0_i32_1 = arith.constant 0 : i32
    return %c0_i32, %c0_i32_0 : i32, i32
  }
  func.func @transform_2(%arg0: i32) -> (i32, i32, i32) {
    %c0_i32 = arith.constant 0 : i32
    %c0_i32_0 = arith.constant 0 : i32
    %c0_i32_1 = arith.constant 0 : i32
    return %arg0, %c0_i32, %c0_i32_0 : i32, i32, i32
  }
}

module attributes {stable_mosaic.version = 11 : i64} {
  func.func @_cqt_mag_kernel(%arg0: i32, %arg1: i32, %arg2: memref<32x256xbf16, #tpu.memory_space<vmem>>, %arg3: memref<1x256x128xbf16, #tpu.memory_space<vmem>>, %arg4: memref<1x16x128xf32, #tpu.memory_space<vmem>>) attributes {dimension_semantics = [#tpu.dimension_semantics<parallel>, #tpu.dimension_semantics<parallel>], iteration_bounds = array<i64: 2, 1>, scalar_prefetch = 0 : i64, scratch_operands = 0 : i64, tpu.core_type = #tpu.core_type<tc>, window_params = [{pipeline_mode = #tpu.pipeline_mode<synchronous>, transform_indices = @transform_0, window_bounds = array<i64: 32, 256>}, {transform_indices = @transform_1, window_bounds = array<i64: 1, 256, 128>}, {transform_indices = @transform_2, window_bounds = array<i64: 1, 16, 128>}]} {
    %c0 = arith.constant 0 : index
    %c0_0 = arith.constant 0 : index
    %0 = vector.load %arg2[%c0, %c0_0] : memref<32x256xbf16, #tpu.memory_space<vmem>>, vector<32x256xbf16>
    %c0_1 = arith.constant 0 : index
    %c0_2 = arith.constant 0 : index
    %c0_3 = arith.constant 0 : index
    %1 = vector.load %arg3[%c0_1, %c0_2, %c0_3] : memref<1x256x128xbf16, #tpu.memory_space<vmem>>, vector<1x256x128xbf16>
    %2 = vector.shape_cast %1 : vector<1x256x128xbf16> to vector<256x128xbf16>
    %cst = arith.constant dense<0.000000e+00> : vector<32x128xf32>
    %3 = tpu.matmul %0, %2, %cst {dimension_numbers = #tpu.dot_dimension_numbers<[1], [0], [0], [1], [0, 0, 1, 1], [], []>} : vector<32x256xbf16>, vector<256x128xbf16>, vector<32x128xf32> -> vector<32x128xf32>
    %4 = vector.extract_strided_slice %3 {offsets = [0, 0], sizes = [16, 128], strides = [1, 1]} : vector<32x128xf32> to vector<16x128xf32>
    %5 = vector.extract_strided_slice %3 {offsets = [16, 0], sizes = [16, 128], strides = [1, 1]} : vector<32x128xf32> to vector<16x128xf32>
    %6 = arith.mulf %4, %4 : vector<16x128xf32>
    %7 = arith.mulf %5, %5 : vector<16x128xf32>
    %8 = arith.addf %6, %7 : vector<16x128xf32>
    %9 = math.sqrt %8 : vector<16x128xf32>
    %c0_4 = arith.constant 0 : index
    %c0_5 = arith.constant 0 : index
    %c0_6 = arith.constant 0 : index
    %10 = vector.load %arg4[%c0_4, %c0_5, %c0_6] : memref<1x16x128xf32, #tpu.memory_space<vmem>>, vector<1x16x128xf32>
    %11 = vector.shape_cast %10 : vector<1x16x128xf32> to vector<16x128xf32>
    %12 = vector.shape_cast %9 : vector<16x128xf32> to vector<1x16x128xf32>
    tpu.vector_store %arg4[%c0_4, %c0_5, %c0_6], %12 {strides = array<i32>} : memref<1x16x128xf32, #tpu.memory_space<vmem>>, vector<1x16x128xf32>,
    return
  }
  func.func @transform_0(%arg0: i32, %arg1: i32) -> (i32, i32) {
    %c0_i32 = arith.constant 0 : i32
    %c0_i32_0 = arith.constant 0 : i32
    %c0_i32_1 = arith.constant 0 : i32
    return %c0_i32, %c0_i32_0 : i32, i32
  }
  func.func @transform_1(%arg0: i32, %arg1: i32) -> (i32, i32, i32) {
    %c0_i32 = arith.constant 0 : i32
    %c0_i32_0 = arith.constant 0 : i32
    return %arg0, %c0_i32, %arg1 : i32, i32, i32
  }
  func.func @transform_2(%arg0: i32, %arg1: i32) -> (i32, i32, i32) {
    %c0_i32 = arith.constant 0 : i32
    %c0_i32_0 = arith.constant 0 : i32
    return %arg0, %c0_i32, %arg1 : i32, i32, i32
  }
}

</mosaic_0001>

<bundles_post_ra>
// kernel: _lambda_.4
= control target key start
LH: loop header
LB: loop body
LE: loop exit
PB: predicated region body
PF: predicated region fallthrough
CT: control target
= control target key end

     0   :  { %7 = vsyncpa [#allocation3], 0  ;;  %s817_s9 = smov 0   ;;  %s841_s0 = inlined_call_operand.vmem [shape: bf16[2,9,256], index: 0, kind: input, shape index: {}]   ;;  %s842_s1 = inlined_call_operand.hbm [shape: bf16[512,128], index: 1, kind: input, shape index: {}]   ;;  %s843_s2 = inlined_call_operand.vmem [shape: f32[2,8,128], index: 2, kind: output, shape index: {}]  }
   0x1 LB: > { %s102_s12 = sshll.u32 %s842_s1, 4  ;;  %s563_s13 = sadd.s32 4294967295, %s797_s9   ;;  %s797_s9 = sphi %s817_s9, %s13_s9   ;;  %s103_s12 = int_to_ptr.hbm [resolvable:$true] %s102_s12 }
   0x2   : > { %p565_p0 = scmp.ge.s32.totalorder %s797_s9, 1  ;;  %p91_p1 = scmp.lt.s32.totalorder %s797_s9, 3 }
   0x3   : > { %p744_p2 = scmp.eq.s32.totalorder %s563_s13, 0  ;;  %s799_s14 = smov [#allocation2]  }
   0x4   : > { %p92_p3 = pnand %p565_p0, %p91_p1  ;;  %s104_s15 = sshll.u32 %s799_s14, 4  ;;  %s105_s15 = int_to_ptr.vmem [resolvable:$true] %s104_s15 }
   0x5   : > { %s800_s16 = smov 64   ;;  %s801_s17 = smov 4  }
   0x6   : > { %p740_p4 = pneg %p92_p3  ;;  %128 = sbr.rel (%p92_p3) target bundleno = 187 (0xbb), region = 28 }
   0x8   : > { %p741_p5 = pnand %p744_p2, %p740_p4 }
   0xa   : > { %743 = dma.hbm_to_vmem [thread:$0]  (!%p741_p5), %s103_s12, 4096, %s105_s15, [#allocation3], %s800_s16, %s800_s16, %s801_s17  }
   0xb   : > { %792 = dma.done.wait (%p744_p2), [#allocation3], 4096  }
   0xc   : > { %794 = vsyncadd (%p744_p2), [#allocation3], 4294963200  ;;  %p150_p6 = scmp.lt.s32.totalorder %s563_s13, 1  ;;  %v727_v0 = vld [vmem:[#allocation2 + $0xb8] sm:$0xff]  ;;  %v726_v4 = vld [vmem:[#allocation2 + $0xb0] sm:$0xff] }
   0xd   : > { %v735_v1 = vld [vmem:[#allocation2 + $0xf8] sm:$0xff]  ;;  %345 = vmatpush.bf16.msra.mxu0 %v727_v0  ;;  %v734_v5 = vld [vmem:[#allocation2 + $0xf0] sm:$0xff]  ;;  %v725_v8 = vld [vmem:[#allocation2 + $0xa8] sm:$0xff] }
   0xe   : > { %v711_v2 = vld [vmem:[#allocation2 + $0x38] sm:$0xff]  ;;  %s845_s13 = smov (!%p150_p6, %s563_s13), 1  ;;  %358 = vmatpush.bf16.msra.mxu1 %v735_v1  ;;  %v710_v6 = vld [vmem:[#allocation2 + $0x30] sm:$0xff]  ;;  %v733_v9 = vld [vmem:[#allocation2 + $0xe8] sm:$0xff] }
   0xf   : > { %v719_v3 = vld [vmem:[#allocation2 + $0x78] sm:$0xff]  ;;  %471 = vmatpush.bf16.msra.mxu2 %v711_v2  ;;  %v718_v7 = vld [vmem:[#allocation2 + $0x70] sm:$0xff]  ;;  %s703_s18 = sshll.u32 %s845_s13, 4  ;;  %v709_v10 = vld [vmem:[#allocation2 + $0x28] sm:$0xff]  ;;  %s572_s22 = sshll.u32 %s845_s13, 3 }
  0x10   : > { %484 = vmatpush.bf16.msra.mxu3 %v719_v3  ;;  %v717_v11 = vld [vmem:[#allocation2 + $0x68] sm:$0xff]  ;;  %s154_s21 = scalar_lea.vmem %s841_s0, %s703_s18  ;;  %v724_v12 = vld [vmem:[#allocation2 + $0xa0] sm:$0xff]  ;;  %v723_v22 = vld [vmem:[#allocation2 + $0x98] sm:$0xff]  ;;  %s158_s25 = scalar_lea.vmem %s843_s2, %s572_s22 }
  0x11   : > { %346 = vmatpush.bf16.msra.mxu0 %v726_v4  ;;  %v732_v13 = vld [vmem:[#allocation2 + $0xe0] sm:$0xff]  ;;  %v159_v14 = vld [vmem:[%s154_s21] sm:$0xff]  ;;  %v722_v28 = vld [vmem:[#allocation2 + $0x90] sm:$0xff] }
  0x12   : > { %359 = vmatpush.bf16.msra.mxu1 %v734_v5  ;;  %v708_v15 = vld [vmem:[#allocation2 + $0x20] sm:$0xff]  ;;  %v227_v18 = vunpack.c.l.b16 %v159_v14  ;;  %v228_v20 = vunpack.c.h.b16 %v159_v14  ;;  %v731_v23 = vld [vmem:[#allocation2 + $0xd8] sm:$0xff]  ;;  %v730_v29 = vld [vmem:[#allocation2 + $0xd0] sm:$0xff] }
  0x13   : > { %472 = vmatpush.bf16.msra.mxu2 %v710_v6  ;;  %v716_v16 = vld [vmem:[#allocation2 + $0x60] sm:$0xff]  ;;  %v707_v24 = vld [vmem:[#allocation2 + $0x18] sm:$0xff]  ;;  %v706_v30 = vld [vmem:[#allocation2 + $0x10] sm:$0xff] }
  0x14   : > { %485 = vmatpush.bf16.msra.mxu3 %v718_v7  ;;  %v160_v17 = vld [vmem:[%s154_s21 + $0x8] sm:$0x11]  ;;  %v715_v25 = vld [vmem:[#allocation2 + $0x58] sm:$0xff]  ;;  %v714_v31 = vld [vmem:[#allocation2 + $0x50] sm:$0xff]  ;;  %v371_v48 = vpack.c.b16 %v227_v18, %v227_v18  ;;  %v372_v49 = vpack.c.b16 %v228_v20, %v228_v20 }
  0x15   : > { %347 = vmatpush.bf16.msra.mxu0 %v725_v8  ;;  %v229_v19 = vunpack.c.l.b16 %v160_v17  ;;  %v230_v21 = vunpack.c.h.b16 %v160_v17  ;;  %v721_v34 = vld [vmem:[#allocation2 + $0x88] sm:$0xff]  ;;  %v720_v42 = vld [vmem:[#allocation2 + $0x80] sm:$0xff] }
  0x16   : > { %360 = vmatpush.bf16.msra.mxu1 %v733_v9  ;;  %v729_v35 = vld [vmem:[#allocation2 + $0xc8] sm:$0xff]  ;;  %v728_v43 = vld [vmem:[#allocation2 + $0xc0] sm:$0xff] }
  0x17   : > { %473 = vmatpush.bf16.msra.mxu2 %v709_v10  ;;  %v231_v26 = vpack.c.b16 %v229_v19, %v227_v18  ;;  %v232_v27 = vpack.c.b16 %v230_v21, %v228_v20  ;;  %v705_v36 = vld [vmem:[#allocation2 + $0x8] sm:$0xff]  ;;  %v704_v44 = vld [vmem:[#allocation2] sm:$0xff] }
  0x18   : > { %486 = vmatpush.bf16.msra.mxu3 %v717_v11  ;;  %v713_v37 = vld [vmem:[#allocation2 + $0x48] sm:$0xff]  ;;  %v712_v45 = vld [vmem:[#allocation2 + $0x40] sm:$0xff] }
  0x19   : > { %348 = vmatpush.bf16.msra.mxu0 %v724_v12  ;;  %v236_v32 = vshll.u32 %v231_v26, 16  ;;  %v243_v33 = vshll.u32 %v232_v27, 16  ;;  %v234_v38 = vshrl.u32 %v231_v26, 16  ;;  %v241_v40 = vshrl.u32 %v232_v27, 16 }
  0x1a   : > { %361 = vmatpush.bf16.msra.mxu1 %v732_v13 }
  0x1b   : > { %474 = vmatpush.bf16.msra.mxu2 %v708_v15  ;;  %v238_v39 = vrot.slane %v236_v32, 1  ;;  %v245_v41 = vrot.slane %v243_v33, 1 }
  0x1c   : > { %487 = vmatpush.bf16.msra.mxu3 %v716_v16 }
  0x1d   : > { %349 = vmatpush.bf16.msra.mxu0 %v723_v22  ;;  %v239_v46 = vor.u32 %v238_v39, %v234_v38  ;;  %v246_v47 = vor.u32 %v245_v41, %v241_v40 }
  0x1e   : > { %362 = vmatpush.bf16.msra.mxu1 %v731_v23 }
  0x1f   : > { %475 = vmatpush.bf16.msra.mxu2 %v707_v24 }
  0x20   : > { %488 = vmatpush.bf16.msra.mxu3 %v715_v25 }
  0x21   : > { %350 = vmatpush.bf16.msra.mxu0 %v722_v28 }
  0x22   : > { %363 = vmatpush.bf16.msra.mxu1 %v730_v29 }
  0x23   : > { %476 = vmatpush.bf16.msra.mxu2 %v706_v30 }
  0x24   : > { %489 = vmatpush.bf16.msra.mxu3 %v714_v31 }
  0x25   : > { %351 = vmatpush.bf16.msra.mxu0 %v721_v34 }
  0x26   : > { %364 = vmatpush.bf16.msra.mxu1 %v729_v35 }
  0x27   : > { %477 = vmatpush.bf16.msra.mxu2 %v705_v36 }
  0x28   : > { %490 = vmatpush.bf16.msra.mxu3 %v713_v37 }
  0x29   : > { %352 = vmatpush.bf16.msra.mxu0 %v720_v42 }
  0x2a   : > { %365 = vmatpush.bf16.msra.mxu1 %v728_v43 }
  0x2b   : > { %478 = vmatpush.bf16.msra.mxu2 %v704_v44 }
  0x2c   : > { %491 = vmatpush.bf16.msra.mxu3 %v712_v45  ;;  %353 = vmatmul.bf16.vlgmr.msra.gmra.mxu0 %v239_v46 }
  0x2d   : > { %366 = vmatmul.bf16.vlgmr.msra.gmra.mxu1 %v246_v47 }
  0x2e   : > { %479 = vmatmul.bf16.vlgmr.msra.gmra.mxu2 %v371_v48 }
  0x2f   : > { %492 = vmatmul.bf16.vlgmr.msra.gmra.mxu3 %v372_v49 }
  0xa9   : > { %v354_v50 = vpop.f32.mrf.mxu0 }
  0xaa   : > { %v367_v51 = vpop.f32.mrf.mxu1 }
  0xab   : > { %v368_v52 = vadd.f32 %v367_v51, %v354_v50 }
  0xb1   : > { %v480_v53 = vpop.f32.mrf.mxu2  ;;  %v356_v56 = vpop.f32.mrf.mxu0 }
  0xb2   : > { %v493_v54 = vpop.f32.mrf.mxu3  ;;  %v481_v55 = vadd.f32 %v480_v53, %v368_v52  ;;  %v369_v57 = vpop.f32.mrf.mxu1 }
  0xb4   : > { %v494_v58 = vadd.f32 %v493_v54, %v481_v55 }
  0xb6   : > { %497 = vst [vmem:[%s158_s25] sm:$0xff] %v494_v58 }
  0xb9   : > { %v482_v59 = vpop.f32.mrf.mxu2 }
  0xba   : > { %v495_v60 = vpop.f32.mrf.mxu3 }
  0xbb PF: > { %s13_s9 = sadd.s32 1, %s797_s9  }
  0xbc   : > { %p10_p7 = scmp.ge.s32.totalorder %s13_s9, 4  }
  0xbe   :  { %12 = sbr.rel (!%p10_p7) target bundleno = 1 (0x1), region = 63 }
  0xc3   :  { %517 = vsyncpa [#allocation3], 1 }
  0xc4   :  { %519 = vsyncpa [#allocation3 + $0x1], 1 }

// kernel: _lambda_.6
= control target key start
LH: loop header
LB: loop body
LE: loop exit
PB: predicated region body
PF: predicated region fallthrough
CT: control target
= control target key end

     0   :  { %7 = vsyncpa [#allocation3], 0  ;;  %s811_s9 = smov 0   ;;  %s835_s0 = inlined_call_operand.vmem [shape: bf16[2,5,256], index: 0, kind: input, shape index: {}]   ;;  %s836_s1 = inlined_call_operand.hbm [shape: bf16[512,128], index: 1, kind: input, shape index: {}]   ;;  %s837_s2 = inlined_call_operand.vmem [shape: f32[2,4,128], index: 2, kind: output, shape index: {}]  }
   0x1 LB: > { %s102_s12 = sshll.u32 %s836_s1, 4  ;;  %s557_s13 = sadd.s32 4294967295, %s791_s9   ;;  %s791_s9 = sphi %s811_s9, %s13_s9   ;;  %s103_s12 = int_to_ptr.hbm [resolvable:$true] %s102_s12 }
   0x2   : > { %p559_p0 = scmp.ge.s32.totalorder %s791_s9, 1  ;;  %p91_p1 = scmp.lt.s32.totalorder %s791_s9, 3 }
   0x3   : > { %p738_p2 = scmp.eq.s32.totalorder %s557_s13, 0  ;;  %s793_s14 = smov [#allocation2]  }
   0x4   : > { %p92_p3 = pnand %p559_p0, %p91_p1  ;;  %s104_s15 = sshll.u32 %s793_s14, 4  ;;  %s105_s15 = int_to_ptr.vmem [resolvable:$true] %s104_s15 }
   0x5   : > { %s794_s16 = smov 64   ;;  %s795_s17 = smov 4  }
   0x6   : > { %p734_p4 = pneg %p92_p3  ;;  %128 = sbr.rel (%p92_p3) target bundleno = 187 (0xbb), region = 28 }
   0x8   : > { %p735_p5 = pnand %p738_p2, %p734_p4 }
   0xa   : > { %737 = dma.hbm_to_vmem [thread:$0]  (!%p735_p5), %s103_s12, 4096, %s105_s15, [#allocation3], %s794_s16, %s794_s16, %s795_s17  }
   0xb   : > { %786 = dma.done.wait (%p738_p2), [#allocation3], 4096  }
   0xc   : > { %788 = vsyncadd (%p738_p2), [#allocation3], 4294963200  ;;  %p150_p6 = scmp.lt.s32.totalorder %s557_s13, 1  ;;  %v721_v0 = vld [vmem:[#allocation2 + $0xb8] sm:$0xff]  ;;  %v720_v4 = vld [vmem:[#allocation2 + $0xb0] sm:$0xff] }
   0xd   : > { %v729_v1 = vld [vmem:[#allocation2 + $0xf8] sm:$0xff]  ;;  %341 = vmatpush.bf16.msra.mxu0 %v721_v0  ;;  %v728_v5 = vld [vmem:[#allocation2 + $0xf0] sm:$0xff]  ;;  %v719_v8 = vld [vmem:[#allocation2 + $0xa8] sm:$0xff] }
   0xe   : > { %v705_v2 = vld [vmem:[#allocation2 + $0x38] sm:$0xff]  ;;  %s839_s13 = smov (!%p150_p6, %s557_s13), 1  ;;  %354 = vmatpush.bf16.msra.mxu1 %v729_v1  ;;  %v704_v6 = vld [vmem:[#allocation2 + $0x30] sm:$0xff]  ;;  %v727_v9 = vld [vmem:[#allocation2 + $0xe8] sm:$0xff] }
   0xf   : > { %v713_v3 = vld [vmem:[#allocation2 + $0x78] sm:$0xff]  ;;  %465 = vmatpush.bf16.msra.mxu2 %v705_v2  ;;  %v712_v7 = vld [vmem:[#allocation2 + $0x70] sm:$0xff]  ;;  %s697_s18 = sshll.u32 %s839_s13, 3  ;;  %v703_v10 = vld [vmem:[#allocation2 + $0x28] sm:$0xff]  ;;  %s566_s22 = sshll.u32 %s839_s13, 2 }
  0x10   : > { %478 = vmatpush.bf16.msra.mxu3 %v713_v3  ;;  %v711_v11 = vld [vmem:[#allocation2 + $0x68] sm:$0xff]  ;;  %s154_s21 = scalar_lea.vmem %s835_s0, %s697_s18  ;;  %v718_v12 = vld [vmem:[#allocation2 + $0xa0] sm:$0xff]  ;;  %v717_v19 = vld [vmem:[#allocation2 + $0x98] sm:$0xff]  ;;  %s158_s25 = scalar_lea.vmem %s837_s2, %s566_s22 }
  0x11   : > { %342 = vmatpush.bf16.msra.mxu0 %v720_v4  ;;  %v726_v13 = vld [vmem:[#allocation2 + $0xe0] sm:$0xff]  ;;  %v159_v14 = vld [vmem:[%s154_s21] sm:$0x77]  ;;  %v716_v25 = vld [vmem:[#allocation2 + $0x90] sm:$0xff] }
  0x12   : > { %355 = vmatpush.bf16.msra.mxu1 %v728_v5  ;;  %v702_v15 = vld [vmem:[#allocation2 + $0x20] sm:$0xff]  ;;  %v225_v17 = vunpack.c.l.b16 %v159_v14  ;;  %v226_v18 = vunpack.c.h.b16 %v159_v14  ;;  %v725_v20 = vld [vmem:[#allocation2 + $0xd8] sm:$0xff]  ;;  %v724_v26 = vld [vmem:[#allocation2 + $0xd0] sm:$0xff] }
  0x13   : > { %466 = vmatpush.bf16.msra.mxu2 %v704_v6  ;;  %v710_v16 = vld [vmem:[#allocation2 + $0x60] sm:$0xff]  ;;  %v701_v21 = vld [vmem:[#allocation2 + $0x18] sm:$0xff]  ;;  %v700_v27 = vld [vmem:[#allocation2 + $0x10] sm:$0xff] }
  0x14   : > { %479 = vmatpush.bf16.msra.mxu3 %v712_v7  ;;  %v709_v22 = vld [vmem:[#allocation2 + $0x58] sm:$0xff]  ;;  %v227_v23 = vpack.c.b16 %v225_v17, %v225_v17  ;;  %v228_v24 = vpack.c.b16 %v226_v18, %v226_v18  ;;  %v708_v28 = vld [vmem:[#allocation2 + $0x50] sm:$0xff]  ;;  %v715_v31 = vld [vmem:[#allocation2 + $0x88] sm:$0xff] }
  0x15   : > { %343 = vmatpush.bf16.msra.mxu0 %v719_v8  ;;  %v723_v32 = vld [vmem:[#allocation2 + $0xc8] sm:$0xff]  ;;  %v714_v39 = vld [vmem:[#allocation2 + $0x80] sm:$0xff] }
  0x16   : > { %356 = vmatpush.bf16.msra.mxu1 %v727_v9  ;;  %v232_v29 = vshll.u32 %v227_v23, 16  ;;  %v239_v30 = vshll.u32 %v228_v24, 16  ;;  %v699_v33 = vld [vmem:[#allocation2 + $0x8] sm:$0xff]  ;;  %v230_v35 = vshrl.u32 %v227_v23, 16  ;;  %v237_v37 = vshrl.u32 %v228_v24, 16  ;;  %v722_v40 = vld [vmem:[#allocation2 + $0xc0] sm:$0xff] }
  0x17   : > { %467 = vmatpush.bf16.msra.mxu2 %v703_v10  ;;  %v707_v34 = vld [vmem:[#allocation2 + $0x48] sm:$0xff]  ;;  %v698_v41 = vld [vmem:[#allocation2] sm:$0xff] }
  0x18   : > { %480 = vmatpush.bf16.msra.mxu3 %v711_v11  ;;  %v234_v36 = vrot.slane %v232_v29, 1  ;;  %v241_v38 = vrot.slane %v239_v30, 1  ;;  %v706_v42 = vld [vmem:[#allocation2 + $0x40] sm:$0xff] }
  0x19   : > { %344 = vmatpush.bf16.msra.mxu0 %v718_v12 }
  0x1a   : > { %357 = vmatpush.bf16.msra.mxu1 %v726_v13  ;;  %v235_v43 = vor.u32 %v234_v36, %v230_v35  ;;  %v242_v44 = vor.u32 %v241_v38, %v237_v37 }
  0x1b   : > { %468 = vmatpush.bf16.msra.mxu2 %v702_v15 }
  0x1c   : > { %481 = vmatpush.bf16.msra.mxu3 %v710_v16 }
  0x1d   : > { %345 = vmatpush.bf16.msra.mxu0 %v717_v19 }
  0x1e   : > { %358 = vmatpush.bf16.msra.mxu1 %v725_v20 }
  0x1f   : > { %469 = vmatpush.bf16.msra.mxu2 %v701_v21 }
  0x20   : > { %482 = vmatpush.bf16.msra.mxu3 %v709_v22 }
  0x21   : > { %346 = vmatpush.bf16.msra.mxu0 %v716_v25 }
  0x22   : > { %359 = vmatpush.bf16.msra.mxu1 %v724_v26 }
  0x23   : > { %470 = vmatpush.bf16.msra.mxu2 %v700_v27 }
  0x24   : > { %483 = vmatpush.bf16.msra.mxu3 %v708_v28 }
  0x25   : > { %347 = vmatpush.bf16.msra.mxu0 %v715_v31 }
  0x26   : > { %360 = vmatpush.bf16.msra.mxu1 %v723_v32 }
  0x27   : > { %471 = vmatpush.bf16.msra.mxu2 %v699_v33 }
  0x28   : > { %484 = vmatpush.bf16.msra.mxu3 %v707_v34 }
  0x29   : > { %348 = vmatpush.bf16.msra.mxu0 %v714_v39 }
  0x2a   : > { %361 = vmatpush.bf16.msra.mxu1 %v722_v40 }
  0x2b   : > { %472 = vmatpush.bf16.msra.mxu2 %v698_v41 }
  0x2c   : > { %485 = vmatpush.bf16.msra.mxu3 %v706_v42  ;;  %349 = vmatmul.bf16.vlgmr.msra.gmra.mxu0 %v235_v43 }
  0x2d   : > { %362 = vmatmul.bf16.vlgmr.msra.gmra.mxu1 %v242_v44 }
  0x2e   : > { %473 = vmatmul.bf16.vlgmr.msra.gmra.mxu2 %v227_v23 }
  0x2f   : > { %486 = vmatmul.bf16.vlgmr.msra.gmra.mxu3 %v228_v24 }
  0xa9   : > { %v350_v45 = vpop.f32.mrf.mxu0 }
  0xaa   : > { %v363_v46 = vpop.f32.mrf.mxu1 }
  0xab   : > { %v364_v47 = vadd.f32 %v363_v46, %v350_v45 }
  0xb1   : > { %v474_v48 = vpop.f32.mrf.mxu2  ;;  %v352_v51 = vpop.f32.mrf.mxu0 }
  0xb2   : > { %v487_v49 = vpop.f32.mrf.mxu3  ;;  %v475_v50 = vadd.f32 %v474_v48, %v364_v47  ;;  %v365_v52 = vpop.f32.mrf.mxu1 }
  0xb4   : > { %v488_v53 = vadd.f32 %v487_v49, %v475_v50 }
  0xb6   : > { %491 = vst [vmem:[%s158_s25] sm:$0xf] %v488_v53 }
  0xb9   : > { %v476_v54 = vpop.f32.mrf.mxu2 }
  0xba   : > { %v489_v55 = vpop.f32.mrf.mxu3 }
  0xbb PF: > { %s13_s9 = sadd.s32 1, %s791_s9  }
  0xbc   : > { %p10_p7 = scmp.ge.s32.totalorder %s13_s9, 4  }
  0xbe   :  { %12 = sbr.rel (!%p10_p7) target bundleno = 1 (0x1), region = 63 }
  0xc3   :  { %511 = vsyncpa [#allocation3], 1 }
  0xc4   :  { %513 = vsyncpa [#allocation3 + $0x1], 1 }

// kernel: _lambda_.7
= control target key start
LH: loop header
LB: loop body
LE: loop exit
PB: predicated region body
PF: predicated region fallthrough
CT: control target
= control target key end

     0   :  { %s676_s9 = smov 0   ;;  %s678_s10 = smov 0   ;;  %s755_s0 = inlined_call_operand.vmem [shape: bf16[32,256], index: 0, kind: input, shape index: {}]   ;;  %s756_s1 = inlined_call_operand.vmem [shape: bf16[2,256,128], index: 1, kind: input, shape index: {}]   ;;  %s757_s2 = inlined_call_operand.vmem [shape: f32[2,16,128], index: 2, kind: output, shape index: {}]  }
   0x1   :  { %s680_s11 = smov 0  }
   0x2 LB: > { %s24_s12 = sadd.s32 1, %s655_s10  ;;  %p484_p0 = scmp.ge.s32.totalorder %s659_s11, 1  ;;  %s659_s11 = sphi %s680_s11, %s12_s11   ;;  %s655_s10 = sphi %s678_s10, %s759_s10   ;;  %s651_s9 = sphi %s676_s9, %s758_s9  }
   0x3   : > { %p26_p1 = scmp.ge.s32.totalorder %s24_s12, 2  ;;  %p131_p2 = scmp.lt.s32.totalorder %s659_s11, 3 }
   0x5   : > { %s761_s12 = smov (%p26_p1, %s24_s12), 0  ;;  %p132_p3 = pnand %p484_p0, %p131_p2 }
   0x6   : > { %p159_p4 = scmp.lt.s32.totalorder (!%p132_p3), %s651_s9, 1 }
   0x7   : > { %135 = sbr.rel (%p132_p3) target bundleno = 216 (0xd8), region = 28 }
   0xc   : > { %s763_s9 = smov (!%p159_p4, %s651_s9), 1  ;;  %v491_v14 = vld [vmem:[%s755_s0] sm:$0xf]  ;;  %v574_v16 = vld [vmem:[%s755_s0 + $0x4] sm:$0xf0] }
   0xd   : > { %s571_s13 = sshll.u32 %s763_s9, 7  ;;  %v499_v17 = vld [vmem:[%s755_s0 + $0x10] sm:$0xf]  ;;  %v576_v19 = vld [vmem:[%s755_s0 + $0x14] sm:$0xf0]  ;;  %v492_v24 = vor.u32 %v574_v16, %v491_v14  ;;  %s572_s5 = sshll.u32 %s763_s9, 4 }
   0xe   : > { %s700_s16 = scalar_lea.vmem %s756_s1, %s571_s13  ;;  %v573_v20 = vld [vmem:[%s755_s0 + $0x4] sm:$0xf]  ;;  %v493_v21 = vld [vmem:[%s755_s0 + $0x8] sm:$0xf0]  ;;  %v575_v22 = vld [vmem:[%s755_s0 + $0x14] sm:$0xf]  ;;  %v500_v25 = vor.u32 %v576_v19, %v499_v17  ;;  %s174_s8 = scalar_lea.vmem %s757_s2, %s572_s5 }
   0xf   : > { %v584_v0 = vld [vmem:[%s700_s16 + $0x38] sm:$0xff]  ;;  %v583_v2 = vld [vmem:[%s700_s16 + $0x30] sm:$0xff]  ;;  %v582_v4 = vld [vmem:[%s700_s16 + $0x28] sm:$0xff]  ;;  %v496_v26 = vor.u32 %v573_v20, %v493_v21 }
  0x10   : > { %v592_v1 = vld [vmem:[%s700_s16 + $0x78] sm:$0xff]  ;;  %327 = vmatpush.bf16.msra.mxu0 %v584_v0  ;;  %593 = vmatpush.bf16.msra.mxu2 %v584_v0  ;;  %v591_v3 = vld [vmem:[%s700_s16 + $0x70] sm:$0xff]  ;;  %v590_v5 = vld [vmem:[%s700_s16 + $0x68] sm:$0xff] }
  0x11   : > { %346 = vmatpush.bf16.msra.mxu1 %v592_v1  ;;  %601 = vmatpush.bf16.msra.mxu3 %v592_v1  ;;  %v581_v6 = vld [vmem:[%s700_s16 + $0x20] sm:$0xff]  ;;  %v580_v8 = vld [vmem:[%s700_s16 + $0x18] sm:$0xff]  ;;  %v579_v10 = vld [vmem:[%s700_s16 + $0x10] sm:$0xff] }
  0x12   : > { %v589_v7 = vld [vmem:[%s700_s16 + $0x60] sm:$0xff]  ;;  %v588_v9 = vld [vmem:[%s700_s16 + $0x58] sm:$0xff]  ;;  %v587_v11 = vld [vmem:[%s700_s16 + $0x50] sm:$0xff] }
  0x13   : > { %v578_v12 = vld [vmem:[%s700_s16 + $0x8] sm:$0xff]  ;;  %v577_v15 = vld [vmem:[%s700_s16] sm:$0xff]  ;;  %v501_v23 = vld [vmem:[%s755_s0 + $0x18] sm:$0xf0] }
  0x14   : > { %328 = vmatpush.bf16.msra.mxu0 %v583_v2  ;;  %594 = vmatpush.bf16.msra.mxu2 %v583_v2  ;;  %v586_v13 = vld [vmem:[%s700_s16 + $0x48] sm:$0xff]  ;;  %v585_v18 = vld [vmem:[%s700_s16 + $0x40] sm:$0xff]  ;;  %v504_v27 = vor.u32 %v575_v22, %v501_v23 }
  0x15   : > { %347 = vmatpush.bf16.msra.mxu1 %v591_v3  ;;  %602 = vmatpush.bf16.msra.mxu3 %v591_v3 }
  0x18   : > { %329 = vmatpush.bf16.msra.mxu0 %v582_v4  ;;  %595 = vmatpush.bf16.msra.mxu2 %v582_v4 }
  0x19   : > { %348 = vmatpush.bf16.msra.mxu1 %v590_v5  ;;  %603 = vmatpush.bf16.msra.mxu3 %v590_v5 }
  0x1c   : > { %330 = vmatpush.bf16.msra.mxu0 %v581_v6  ;;  %596 = vmatpush.bf16.msra.mxu2 %v581_v6 }
  0x1d   : > { %349 = vmatpush.bf16.msra.mxu1 %v589_v7  ;;  %604 = vmatpush.bf16.msra.mxu3 %v589_v7 }
  0x20   : > { %331 = vmatpush.bf16.msra.mxu0 %v580_v8  ;;  %597 = vmatpush.bf16.msra.mxu2 %v580_v8 }
  0x21   : > { %350 = vmatpush.bf16.msra.mxu1 %v588_v9  ;;  %605 = vmatpush.bf16.msra.mxu3 %v588_v9 }
  0x24   : > { %332 = vmatpush.bf16.msra.mxu0 %v579_v10  ;;  %598 = vmatpush.bf16.msra.mxu2 %v579_v10 }
  0x25   : > { %351 = vmatpush.bf16.msra.mxu1 %v587_v11  ;;  %606 = vmatpush.bf16.msra.mxu3 %v587_v11 }
  0x28   : > { %333 = vmatpush.bf16.msra.mxu0 %v578_v12  ;;  %599 = vmatpush.bf16.msra.mxu2 %v578_v12 }
  0x29   : > { %352 = vmatpush.bf16.msra.mxu1 %v586_v13  ;;  %607 = vmatpush.bf16.msra.mxu3 %v586_v13 }
  0x2c   : > { %334 = vmatpush.bf16.msra.mxu0 %v577_v15  ;;  %600 = vmatpush.bf16.msra.mxu2 %v577_v15 }
  0x2d   : > { %353 = vmatpush.bf16.msra.mxu1 %v585_v18  ;;  %608 = vmatpush.bf16.msra.mxu3 %v585_v18 }
  0x2f   : > { %335 = vmatmul.bf16.vlgmr.msra.gmra.mxu0 %v492_v24  ;;  %340 = vmatmul.bf16.vlgmr.msra.gmra.mxu2 %v500_v25 }
  0x30   : > { %354 = vmatmul.bf16.vlgmr.msra.gmra.mxu1 %v496_v26  ;;  %359 = vmatmul.bf16.vlgmr.msra.gmra.mxu3 %v504_v27 }
  0xac   : > { %v336_v28 = vpop.f32.mrf.mxu0 }
  0xad   : > { %v355_v29 = vpop.f32.mrf.mxu1 }
  0xae   : > { %v356_v30 = vadd.f32 %v355_v29, %v336_v28 }
  0xb0   : > { %v365_v33 = vmul.f32 %v356_v30, %v356_v30 }
  0xb2   : > { %v341_v31 = vpop.f32.mrf.mxu2 }
  0xb3   : > { %v360_v32 = vpop.f32.mrf.mxu3 }
  0xb4   : > { %v361_v34 = vadd.f32 %v360_v32, %v341_v31  ;;  %v338_v36 = vpop.f32.mrf.mxu0 }
  0xb5   : > { %v357_v37 = vpop.f32.mrf.mxu1 }
  0xb6   : > { %v367_v35 = vmul.f32 %v361_v34, %v361_v34  ;;  %v358_v39 = vadd.f32 %v357_v37, %v338_v36 }
  0xb8   : > { %v369_v38 = vadd.f32 %v367_v35, %v365_v33  ;;  %v366_v43 = vmul.f32 %v358_v39, %v358_v39 }
  0xba   : > { %633 = vrsqrt.f32 %v369_v38  ;;  %v343_v40 = vpop.f32.mrf.mxu2  ;;  %vm378_vm0 = vcmp.eq.f32.partialorder %v369_v38, inf  ;;  %v381_v56 = vand.u32 2147483648, %v369_v38  ;;  %vm380_vm1 = vcmp.eq.f32.partialorder %v369_v38, 0.0 }
  0xbb   : > { %v362_v41 = vpop.f32.mrf.mxu3 }
  0xbc   : > { %v363_v42 = vadd.f32 %v362_v41, %v343_v40 }
  0xbe   : > { %v368_v44 = vmul.f32 %v363_v42, %v363_v42 }
  0xc0   : > { %v634_v45 = vpop.eup %633  ;;  %v370_v46 = vadd.f32 %v368_v44, %v366_v43 }
  0xc1   : > { %v372_v47 = vmul.f32 %v634_v45, %v369_v38 }
  0xc2   : > { %635 = vrsqrt.f32 %v370_v46  ;;  %vm390_vm2 = vcmp.eq.f32.partialorder %v370_v46, inf  ;;  %v393_v63 = vand.u32 2147483648, %v370_v46  ;;  %vm392_vm3 = vcmp.eq.f32.partialorder %v370_v46, 0.0 }
  0xc3   : > { %v373_v48 = vmul.f32 %v634_v45, %v372_v47 }
  0xc5   : > { %v374_v49 = vmul.f32 0.5, %v373_v48 }
  0xc7   : > { %v375_v50 = vsub.f32 1.5, %v374_v49 }
  0xc8   : > { %v636_v51 = vpop.eup %635 }
  0xc9   : > { %v376_v52 = vmul.f32 %v634_v45, %v375_v50  ;;  %v384_v53 = vmul.f32 %v636_v51, %v370_v46 }
  0xcb   : > { %v377_v54 = vmul.f32 %v376_v52, %v369_v38  ;;  %v385_v55 = vmul.f32 %v636_v51, %v384_v53 }
  0xcd   : > { %v379_v57 = vsel %vm378_vm0, %v369_v38, %v377_v54  ;;  %v386_v58 = vmul.f32 0.5, %v385_v55 }
  0xce   : > { %v382_v59 = vsel %vm380_vm1, %v381_v56, %v379_v57 }
  0xcf   : > { %395 = vst [vmem:[%s174_s8] sm:$0xff] %v382_v59  ;;  %v387_v60 = vsub.f32 1.5, %v386_v58 }
  0xd1   : > { %v388_v61 = vmul.f32 %v636_v51, %v387_v60 }
  0xd3   : > { %v389_v62 = vmul.f32 %v388_v61, %v370_v46 }
  0xd5   : > { %v391_v0 = vsel %vm390_vm2, %v370_v46, %v389_v62 }
  0xd6   : > { %v394_v1 = vsel %vm392_vm3, %v393_v63, %v391_v0 }
  0xd7   : > { %396 = vst [vmem:[%s174_s8 + $0x8] sm:$0xff] %v394_v1 }
  0xd8 PF: > { %s12_s11 = sadd.s32 1, %s659_s11   ;;  %s758_s9 = smov %s655_s10 }
  0xd9   : > { %p9_p5 = scmp.ge.s32.totalorder %s12_s11, 4   ;;  %s759_s10 = smov %s761_s12 }
  0xdb   :  { %11 = sbr.rel (!%p9_p5) target bundleno = 2 (0x2), region = 58 }

</bundles_post_ra>
